<compile_context>
chip_gen: v5e
topology: v5e:2x2
jax: 0.10.0
libtpu: 0.0.40
codegen_flags: <defaults>
</compile_context>

<pallas_src>
import jax
import jax.numpy as jnp
from jax import lax
from jax.experimental import pallas as pl
from jax.experimental.pallas import tpu as pltpu


_NEG_LARGE = -1e30  # stands in for -inf on padded class columns


# ----------------------------------------------------------------------------
# Kernel
# ----------------------------------------------------------------------------
def _make_kernel(seq_len, need_s_mask):
    """Kernel factory (seq_len / masking decision are trace-time constants)."""

    def kernel(x_ref, watt_ref, wcls_ref, bcls_ref, o_ref, acc_ref):
        # x_ref:    [TB, TS, D]  streamed batch/sequence tile (native dtype)
        # watt_ref: [1, D]       attention weight (VMEM-resident)
        # wcls_ref: [D, Cp]      classifier weight, transposed + lane-padded
        # bcls_ref: [1, Cp]      classifier bias, padded columns = -1e30
        # o_ref:    [TB, Cp]     softmax probabilities (padded columns -> 0)
        # acc_ref:  [TB, D] f32  pooled accumulator (scratch, lives across s)
        s_blk = pl.program_id(1)

        @pl.when(s_blk == 0)
        def _init():
            acc_ref[...] = jnp.zeros_like(acc_ref)

        xb = x_ref[...].astype(jnp.float32)            # upcast in VMEM only
        tb, ts, d = xb.shape

        if need_s_mask:
            # Zero padded sequence rows of the ragged last S block so they
            # contribute nothing to the pooled sum.
            s_pos = s_blk * ts + lax.broadcasted_iota(jnp.int32, (1, ts, 1), 1)
            xb = jnp.where(s_pos < seq_len, xb, 0.0)

        w_att = jnp.reshape(watt_ref[...], (1, 1, d))
        # Attention scores: VPU multiply + XLU lane reduce (N=1 -> keep off MXU).
        attn = jnp.sum(xb * w_att, axis=-1, keepdims=True)       # [TB, TS, 1]
        # Attention-weighted pooling of this sequence chunk.
        acc_ref[...] += jnp.sum(attn * xb, axis=1)                # [TB, D]

        @pl.when(s_blk == pl.num_programs(1) - 1)
        def _finalize():
            # Classifier: lane-dense N (Cp multiple of 128) -> MXU matmul.
            logits = jnp.dot(acc_ref[...], wcls_ref[...],
                             preferred_element_type=jnp.float32)  # [TB, Cp]
            logits = logits + bcls_ref[...]           # padded cols -> -1e30
            # Softmax(dim=1); padded columns give exp(-1e30 - m) == 0.
            m = jnp.max(logits, axis=-1, keepdims=True)
            e = jnp.exp(logits - m)
            denom = jnp.sum(e, axis=-1, keepdims=True)
            # Exact reciprocal: memory-bound kernel, EUP latency is hidden.
            o_ref[...] = e * pl.reciprocal(denom)

    return kernel


# ----------------------------------------------------------------------------
# Tiling / VMEM budgeting
# ----------------------------------------------------------------------------
def _round_down_mult(v, m):
    return (v // m) * m


def _vmem_limit_bytes():
    # ~70% of physical VMEM, capped at 100 MiB:
    #   v5e/v6e (128 MiB physical) -> ~90 MiB, v7x (64 MiB) -> ~45 MiB.
    try:
        phys = pltpu.get_tpu_info().vmem_capacity_bytes
    except Exception:
        phys = 64 << 20  # assume the smallest generation (v7x) if query fails
    return int(min(phys * 0.70, 100 << 20))


def _choose_tiles(B, S, D, Cp, x_itemsize, vmem_limit_bytes):
    """Pick (TB, TS) so the full working set fits ~75% of the scoped VMEM.

    Working set per grid step (including what the old heuristic missed):
      2 x [TB,TS,D] x tile (double-buffered, native dtype)
      ~3 x [TB,TS,D] f32    (upcast + two elementwise products)
      1 x [TB,D]  f32       (pooled accumulator scratch)
      2 x [TB,Cp] f32       (double-buffered output tile)
      + weights (assume double-buffered for the budget = worst case).
    """
    budget = int(vmem_limit_bytes * 0.75)
    budget -= 2 * 4 * (D + D * Cp + Cp)
    budget = max(budget, 1 << 20)

    per_elem = 2 * x_itemsize + 3 * 4          # bytes per x element of the tile
    per_row_fixed = 4 * (D + 2 * Cp)           # acc row + 2x out row

    # Try full-sequence tiles first.
    TS = S
    tb = budget // (TS * D * per_elem + per_row_fixed)
    if tb < 8 and S > 8:
        # Even 8 batch rows at full S do not fit: chunk the sequence instead.
        tb = 8
        ts = (budget // 8 - per_row_fixed) // (D * per_elem)
        TS = min(S, max(8, _round_down_mult(ts, 8)))
    tb = max(int(tb), 1)

    # Megacore: keep >= 2 batch blocks (>= 4 for larger B) so both v7x
    # TensorCores get work; the 8-sublane rule forbids splitting B <= 8.
    if B >= 32:
        cap = max(8, _round_down_mult(B // 4, 8))
    elif B >= 16:
        cap = max(8, _round_down_mult(B // 2, 8))
    else:
        cap = B
    TB = min(tb, cap, 512, B)
    if B < 8:
        TB = B                               # block must equal the tiny batch
    elif TB != B:
        TB = max(8, _round_down_mult(TB, 8))
    return TB, TS


# ----------------------------------------------------------------------------
# Wrapper
# ----------------------------------------------------------------------------
def prepare_params(w_att, w_cls, b_cls):
    """One-time weight prep (hoisted out of the per-call path).

    w_att: [1, D]  attention.weight  (nn.Linear(word_dim, 1, bias=False))
    w_cls: [C, D]  classifier.weight (nn.Linear(word_dim, output_dim))
    b_cls: [C]     classifier.bias
    """
    D = w_att.shape[-1]
    C = w_cls.shape[0]
    # Lane-pad the class dim so output stores are unmasked; Cp stays at 128
    # unless C itself exceeds 128 (the classifier matmul is negligible work).
    Cp = max(128, ((C + 127) // 128) * 128)
    watt = jnp.reshape(w_att, (1, D)).astype(jnp.float32)
    wcls_t = jnp.zeros((D, Cp), jnp.float32).at[:, :C].set(
        jnp.transpose(w_cls).astype(jnp.float32))
    bcls_p = jnp.full((1, Cp), _NEG_LARGE, jnp.float32).at[0, :C].set(
        b_cls.astype(jnp.float32))
    return watt, wcls_t, bcls_p, C


def linmodel_forward(x, params, *, batch_tile=None, seq_tile=None):
    """LinModel.forward for a 3-D input.

    x:      [B, S, D] (any float dtype; streamed in its native dtype)
    params: output of prepare_params(...)
    returns [B, C] float32 softmax probabilities.
    """
    # TODO(synk): shape_len == 2 path (sum over axis=0 then Softmax(dim=1))
    # raises in PyTorch itself (1-D tensor has no dim=1); only 3-D implemented.
    watt, wcls_t, bcls_p, C = params
    B, S, D = x.shape
    Cp = wcls_t.shape[1]
    assert wcls_t.shape[0] == D, "word_dim mismatch between x and weights"

    vmem_limit = _vmem_limit_bytes()
    TB, TS = _choose_tiles(B, S, D, Cp, jnp.dtype(x.dtype).itemsize, vmem_limit)
    if batch_tile is not None:
        TB = batch_tile
    if seq_tile is not None:
        TS = seq_tile

    nb = pl.cdiv(B, TB)
    ns = pl.cdiv(S, TS)
    need_s_mask = (S % TS) != 0
    kernel = _make_kernel(S, need_s_mask)

    # NOTE: when B % TB != 0 the last batch block reads out-of-bounds rows and
    # runs softmax on garbage; those rows are dropped on the (masked) output
    # write, so this is benign — do not "fix" it by reading the padded rows.

    cost = pl.CostEstimate(
        flops=4 * B * S * D + 2 * B * D * Cp + 3 * B * Cp,
        transcendentals=B * Cp + B,
        bytes_accessed=(B * S * D * jnp.dtype(x.dtype).itemsize
                        + 4 * (D + D * Cp + Cp + B * Cp)),
    )

    def _call(single_buffer_weights):
        if single_buffer_weights:
            def w_spec(shape):
                return pl.BlockSpec(shape, lambda i, s: (0, 0),
                                    pipeline_mode=pl.Buffered(1))
        else:
            def w_spec(shape):
                return pl.BlockSpec(shape, lambda i, s: (0, 0))

        return pl.pallas_call(
            kernel,
            out_shape=jax.ShapeDtypeStruct((B, Cp), jnp.float32),
            grid=(nb, ns),
            in_specs=[
                # streamed x tiles, native dtype (batch parallel, seq reduction)
                pl.BlockSpec((TB, TS, D), lambda i, s: (i, s, 0)),
                # VMEM-resident weights (constant index_map -> fetched once)
                w_spec((1, D)),
                w_spec((D, Cp)),
                w_spec((1, Cp)),
            ],
            out_specs=pl.BlockSpec((TB, Cp), lambda i, s: (i, 0)),
            scratch_shapes=[pltpu.VMEM((TB, D), jnp.float32)],
            compiler_params=pltpu.CompilerParams(
                dimension_semantics=("parallel", "arbitrary"),
                vmem_limit_bytes=vmem_limit,
            ),
            cost_estimate=cost,
        )(x, watt, wcls_t, bcls_p)

    try:
        # Single-buffer the three resident operands (reclaims VMEM for x tiles).
        out = _call(True)
    except Exception:
        # Fallback for jax versions without BlockSpec(pipeline_mode=...):
        # default double-buffering is still correct, just a few extra MiB.
        out = _call(False)

    return out[:, :C]


def reference_forward(x, w_att, w_cls, b_cls):
    attn = x @ jnp.transpose(w_att)          # [B, S, 1]
    pooled = jnp.sum(attn * x, axis=1)       # [B, D]
    logits = pooled @ jnp.transpose(w_cls) + b_cls
    return jax.nn.softmax(logits, axis=1)


if __name__ == "__main__":
    key = jax.random.PRNGKey(0)
    kx, ka, kw, kb = jax.random.split(key, 4)

    batch, seq, word_dim, output_dim = 8, 8, 32, 4

    x = jax.random.normal(kx, (batch, seq, word_dim), dtype=jnp.float32)
    bound = 1.0 / (word_dim ** 0.5)
    w_att = jax.random.uniform(ka, (1, word_dim), jnp.float32, -bound, bound)
    w_cls = jax.random.uniform(kw, (output_dim, word_dim), jnp.float32, -bound, bound)
    b_cls = jax.random.uniform(kb, (output_dim,), jnp.float32, -bound, bound)

    params = prepare_params(w_att, w_cls, b_cls)   # hoisted, done once

    # --- test 1: small batch, single grid block, f32 input ------------------
    out = jax.block_until_ready(linmodel_forward(x, params))
    ref = reference_forward(x, w_att, w_cls, b_cls)
    assert out.shape == (batch, output_dim)
    assert jnp.allclose(out, ref, atol=1e-5, rtol=1e-5), \
        float(jnp.max(jnp.abs(out - ref)))
    assert jnp.allclose(jnp.sum(out, axis=1), 1.0, atol=1e-5)

    # --- test 2: multi-block batch grid + ragged sequence chunking ----------
    B2, S2 = 20, 20   # B2 % TB != 0 and S2 % TS != 0 exercise the masked paths
    x2 = jax.random.normal(jax.random.PRNGKey(1), (B2, S2, word_dim), jnp.float32)
    out2 = jax.block_until_ready(linmodel_forward(x2, params, seq_tile=8))
    ref2 = reference_forward(x2, w_att, w_cls, b_cls)
    assert out2.shape == (B2, output_dim)
    assert jnp.allclose(out2, ref2, atol=1e-5, rtol=1e-5), \
        float(jnp.max(jnp.abs(out2 - ref2)))

    # --- test 3: bf16 input streams in native dtype (half the HBM bytes) ----
    x_bf16 = x.astype(jnp.bfloat16)
    out3 = jax.block_until_ready(linmodel_forward(x_bf16, params))
    ref3 = reference_forward(x_bf16.astype(jnp.float32), w_att, w_cls, b_cls)
    assert jnp.allclose(out3, ref3, atol=1e-5, rtol=1e-5), \
        float(jnp.max(jnp.abs(out3 - ref3)))

    print("KERNEL_OK")
</pallas_src>

<mosaic_0001>
module attributes {stable_mosaic.version = 11 : i64} {
  func.func @kernel(%arg0: i32, %arg1: i32, %arg2: memref<8x8x32xf32, #tpu.memory_space<vmem>>, %arg3: memref<1x32xf32, #tpu.memory_space<vmem>>, %arg4: memref<32x128xf32, #tpu.memory_space<vmem>>, %arg5: memref<1x128xf32, #tpu.memory_space<vmem>>, %arg6: memref<8x128xf32, #tpu.memory_space<vmem>>, %arg7: memref<8x32xf32, #tpu.memory_space<vmem>>) attributes {dimension_semantics = [#tpu.dimension_semantics<parallel>, #tpu.dimension_semantics<arbitrary>], iteration_bounds = array<i64: 1, 1>, scalar_prefetch = 0 : i64, scratch_operands = 1 : i64, tpu.core_type = #tpu.core_type<tc>, window_params = [{transform_indices = @transform_0, window_bounds = array<i64: 8, 8, 32>}, {pipeline_mode = #tpu.pipeline_mode<synchronous>, transform_indices = @transform_1, window_bounds = array<i64: 1, 32>}, {pipeline_mode = #tpu.pipeline_mode<synchronous>, transform_indices = @transform_2, window_bounds = array<i64: 32, 128>}, {pipeline_mode = #tpu.pipeline_mode<synchronous>, transform_indices = @transform_3, window_bounds = array<i64: 1, 128>}, {transform_indices = @transform_4, window_bounds = array<i64: 8, 128>}]} {
    %c0_i32 = arith.constant 0 : i32
    %0 = arith.cmpi eq, %arg1, %c0_i32 : i32
    %1 = arith.extui %0 : i1 to i32
    %c0_i32_0 = arith.constant 0 : i32
    %2 = arith.cmpi ne, %1, %c0_i32_0 : i32
    scf.if %2 {
      %cst_12 = arith.constant 0.000000e+00 : f32
      %19 = vector.broadcast %cst_12 : f32 to vector<8x32xf32>
      %c0_13 = arith.constant 0 : index
      %c0_14 = arith.constant 0 : index
      %20 = vector.load %arg7[%c0_13, %c0_14] : memref<8x32xf32, #tpu.memory_space<vmem>>, vector<8x32xf32>
      tpu.vector_store %arg7[%c0_13, %c0_14], %19 {strides = array<i32>} : memref<8x32xf32, #tpu.memory_space<vmem>>, vector<8x32xf32>,
    } else {
    }
    %c0 = arith.constant 0 : index
    %c0_1 = arith.constant 0 : index
    %c0_2 = arith.constant 0 : index
    %3 = vector.load %arg2[%c0, %c0_1, %c0_2] : memref<8x8x32xf32, #tpu.memory_space<vmem>>, vector<8x8x32xf32>
    %c0_3 = arith.constant 0 : index
    %c0_4 = arith.constant 0 : index
    %4 = vector.load %arg3[%c0_3, %c0_4] : memref<1x32xf32, #tpu.memory_space<vmem>>, vector<1x32xf32>
    %5 = vector.shape_cast %4 : vector<1x32xf32> to vector<1x1x32xf32>
    %6 = vector.broadcast %5 : vector<1x1x32xf32> to vector<8x8x32xf32>
    %7 = arith.mulf %3, %6 : vector<8x8x32xf32>
    %cst = arith.constant dense<0.000000e+00> : vector<8x8xf32>
    %8 = vector.multi_reduction <add>, %7, %cst [2] : vector<8x8x32xf32> to vector<8x8xf32>
    %9 = vector.shape_cast %8 : vector<8x8xf32> to vector<8x8x1xf32>
    %c0_5 = arith.constant 0 : index
    %c0_6 = arith.constant 0 : index
    %10 = vector.load %arg7[%c0_5, %c0_6] : memref<8x32xf32, #tpu.memory_space<vmem>>, vector<8x32xf32>
    %11 = vector.broadcast %9 : vector<8x8x1xf32> to vector<8x8x32xf32>
    %12 = arith.mulf %11, %3 : vector<8x8x32xf32>
    %cst_7 = arith.constant dense<0.000000e+00> : vector<8x32xf32>
    %13 = vector.multi_reduction <add>, %12, %cst_7 [1] : vector<8x8x32xf32> to vector<8x32xf32>
    %14 = arith.addf %10, %13 : vector<8x32xf32>
    %c0_8 = arith.constant 0 : index
    %c0_9 = arith.constant 0 : index
    %15 = vector.load %arg7[%c0_8, %c0_9] : memref<8x32xf32, #tpu.memory_space<vmem>>, vector<8x32xf32>
    tpu.vector_store %arg7[%c0_8, %c0_9], %14 {strides = array<i32>} : memref<8x32xf32, #tpu.memory_space<vmem>>, vector<8x32xf32>,
    %c0_i32_10 = arith.constant 0 : i32
    %16 = arith.cmpi eq, %arg1, %c0_i32_10 : i32
    %17 = arith.extui %16 : i1 to i32
    %c0_i32_11 = arith.constant 0 : i32
    %18 = arith.cmpi ne, %17, %c0_i32_11 : i32
    scf.if %18 {
      %c0_12 = arith.constant 0 : index
      %c0_13 = arith.constant 0 : index
      %19 = vector.load %arg7[%c0_12, %c0_13] : memref<8x32xf32, #tpu.memory_space<vmem>>, vector<8x32xf32>
      %c0_14 = arith.constant 0 : index
      %c0_15 = arith.constant 0 : index
      %20 = vector.load %arg4[%c0_14, %c0_15] : memref<32x128xf32, #tpu.memory_space<vmem>>, vector<32x128xf32>
      %cst_16 = arith.constant dense<0.000000e+00> : vector<8x128xf32>
      %21 = tpu.matmul %19, %20, %cst_16 {dimension_numbers = #tpu.dot_dimension_numbers<[1], [0], [0], [1], [0, 0, 1, 1], [], []>} : vector<8x32xf32>, vector<32x128xf32>, vector<8x128xf32> -> vector<8x128xf32>
      %c0_17 = arith.constant 0 : index
      %c0_18 = arith.constant 0 : index
      %22 = vector.load %arg5[%c0_17, %c0_18] : memref<1x128xf32, #tpu.memory_space<vmem>>, vector<1x128xf32>
      %23 = vector.broadcast %22 : vector<1x128xf32> to vector<8x128xf32>
      %24 = arith.addf %21, %23 : vector<8x128xf32>
      %cst_19 = arith.constant dense<0xFF800000> : vector<8xf32>
      %25 = vector.multi_reduction <maximumf>, %24, %cst_19 [1] : vector<8x128xf32> to vector<8xf32>
      %26 = vector.shape_cast %25 : vector<8xf32> to vector<8x1xf32>
      %27 = vector.broadcast %26 : vector<8x1xf32> to vector<8x128xf32>
      %28 = arith.subf %24, %27 : vector<8x128xf32>
      %29 = math.exp %28 : vector<8x128xf32>
      %cst_20 = arith.constant dense<0.000000e+00> : vector<8xf32>
      %30 = vector.multi_reduction <add>, %29, %cst_20 [1] : vector<8x128xf32> to vector<8xf32>
      %31 = vector.shape_cast %30 : vector<8xf32> to vector<8x1xf32>
      %32 = tpu.reciprocal %31 : vector<8x1xf32> -> vector<8x1xf32>
      %33 = vector.broadcast %32 : vector<8x1xf32> to vector<8x128xf32>
      %34 = arith.mulf %29, %33 : vector<8x128xf32>
      %c0_21 = arith.constant 0 : index
      %c0_22 = arith.constant 0 : index
      %35 = vector.load %arg6[%c0_21, %c0_22] : memref<8x128xf32, #tpu.memory_space<vmem>>, vector<8x128xf32>
      tpu.vector_store %arg6[%c0_21, %c0_22], %34 {strides = array<i32>} : memref<8x128xf32, #tpu.memory_space<vmem>>, vector<8x128xf32>,
    } else {
    }
    return
  }
  func.func @transform_0(%arg0: i32, %arg1: i32) -> (i32, i32, i32) {
    %c0_i32 = arith.constant 0 : i32
    %c0_i32_0 = arith.constant 0 : i32
    return %arg0, %arg1, %c0_i32 : i32, i32, i32
  }
  func.func @transform_1(%arg0: i32, %arg1: i32) -> (i32, i32) {
    %c0_i32 = arith.constant 0 : i32
    %c0_i32_0 = arith.constant 0 : i32
    %c0_i32_1 = arith.constant 0 : i32
    return %c0_i32, %c0_i32_0 : i32, i32
  }
  func.func @transform_2(%arg0: i32, %arg1: i32) -> (i32, i32) {
    %c0_i32 = arith.constant 0 : i32
    %c0_i32_0 = arith.constant 0 : i32
    %c0_i32_1 = arith.constant 0 : i32
    return %c0_i32, %c0_i32_0 : i32, i32
  }
  func.func @transform_3(%arg0: i32, %arg1: i32) -> (i32, i32) {
    %c0_i32 = arith.constant 0 : i32
    %c0_i32_0 = arith.constant 0 : i32
    %c0_i32_1 = arith.constant 0 : i32
    return %c0_i32, %c0_i32_0 : i32, i32
  }
  func.func @transform_4(%arg0: i32, %arg1: i32) -> (i32, i32) {
    %c0_i32 = arith.constant 0 : i32
    %c0_i32_0 = arith.constant 0 : i32
    return %arg0, %c0_i32 : i32, i32
  }
}

module attributes {stable_mosaic.version = 11 : i64} {
  func.func @kernel(%arg0: i32, %arg1: i32, %arg2: memref<8x8x32xf32, #tpu.memory_space<vmem>>, %arg3: memref<1x32xf32, #tpu.memory_space<vmem>>, %arg4: memref<32x128xf32, #tpu.memory_space<vmem>>, %arg5: memref<1x128xf32, #tpu.memory_space<vmem>>, %arg6: memref<8x128xf32, #tpu.memory_space<vmem>>, %arg7: memref<8x32xf32, #tpu.memory_space<vmem>>) attributes {dimension_semantics = [#tpu.dimension_semantics<parallel>, #tpu.dimension_semantics<arbitrary>], iteration_bounds = array<i64: 1, 1>, scalar_prefetch = 0 : i64, scratch_operands = 1 : i64, tpu.core_type = #tpu.core_type<tc>, window_params = [{transform_indices = @transform_0, window_bounds = array<i64: 8, 8, 32>}, {pipeline_mode = #tpu.pipeline_mode<synchronous>, transform_indices = @transform_1, window_bounds = array<i64: 1, 32>}, {pipeline_mode = #tpu.pipeline_mode<synchronous>, transform_indices = @transform_2, window_bounds = array<i64: 32, 128>}, {pipeline_mode = #tpu.pipeline_mode<synchronous>, transform_indices = @transform_3, window_bounds = array<i64: 1, 128>}, {transform_indices = @transform_4, window_bounds = array<i64: 8, 128>}]} {
    %c0_i32 = arith.constant 0 : i32
    %0 = arith.cmpi eq, %arg1, %c0_i32 : i32
    %1 = arith.extui %0 : i1 to i32
    %c0_i32_0 = arith.constant 0 : i32
    %2 = arith.cmpi ne, %1, %c0_i32_0 : i32
    scf.if %2 {
      %cst_12 = arith.constant 0.000000e+00 : f32
      %19 = vector.broadcast %cst_12 : f32 to vector<8x32xf32>
      %c0_13 = arith.constant 0 : index
      %c0_14 = arith.constant 0 : index
      %20 = vector.load %arg7[%c0_13, %c0_14] : memref<8x32xf32, #tpu.memory_space<vmem>>, vector<8x32xf32>
      tpu.vector_store %arg7[%c0_13, %c0_14], %19 {strides = array<i32>} : memref<8x32xf32, #tpu.memory_space<vmem>>, vector<8x32xf32>,
    } else {
    }
    %c0 = arith.constant 0 : index
    %c0_1 = arith.constant 0 : index
    %c0_2 = arith.constant 0 : index
    %3 = vector.load %arg2[%c0, %c0_1, %c0_2] : memref<8x8x32xf32, #tpu.memory_space<vmem>>, vector<8x8x32xf32>
    %c0_3 = arith.constant 0 : index
    %c0_4 = arith.constant 0 : index
    %4 = vector.load %arg3[%c0_3, %c0_4] : memref<1x32xf32, #tpu.memory_space<vmem>>, vector<1x32xf32>
    %5 = vector.shape_cast %4 : vector<1x32xf32> to vector<1x1x32xf32>
    %6 = vector.broadcast %5 : vector<1x1x32xf32> to vector<8x8x32xf32>
    %7 = arith.mulf %3, %6 : vector<8x8x32xf32>
    %cst = arith.constant dense<0.000000e+00> : vector<8x8xf32>
    %8 = vector.multi_reduction <add>, %7, %cst [2] : vector<8x8x32xf32> to vector<8x8xf32>
    %9 = vector.shape_cast %8 : vector<8x8xf32> to vector<8x8x1xf32>
    %c0_5 = arith.constant 0 : index
    %c0_6 = arith.constant 0 : index
    %10 = vector.load %arg7[%c0_5, %c0_6] : memref<8x32xf32, #tpu.memory_space<vmem>>, vector<8x32xf32>
    %11 = vector.broadcast %9 : vector<8x8x1xf32> to vector<8x8x32xf32>
    %12 = arith.mulf %11, %3 : vector<8x8x32xf32>
    %cst_7 = arith.constant dense<0.000000e+00> : vector<8x32xf32>
    %13 = vector.multi_reduction <add>, %12, %cst_7 [1] : vector<8x8x32xf32> to vector<8x32xf32>
    %14 = arith.addf %10, %13 : vector<8x32xf32>
    %c0_8 = arith.constant 0 : index
    %c0_9 = arith.constant 0 : index
    %15 = vector.load %arg7[%c0_8, %c0_9] : memref<8x32xf32, #tpu.memory_space<vmem>>, vector<8x32xf32>
    tpu.vector_store %arg7[%c0_8, %c0_9], %14 {strides = array<i32>} : memref<8x32xf32, #tpu.memory_space<vmem>>, vector<8x32xf32>,
    %c0_i32_10 = arith.constant 0 : i32
    %16 = arith.cmpi eq, %arg1, %c0_i32_10 : i32
    %17 = arith.extui %16 : i1 to i32
    %c0_i32_11 = arith.constant 0 : i32
    %18 = arith.cmpi ne, %17, %c0_i32_11 : i32
    scf.if %18 {
      %c0_12 = arith.constant 0 : index
      %c0_13 = arith.constant 0 : index
      %19 = vector.load %arg7[%c0_12, %c0_13] : memref<8x32xf32, #tpu.memory_space<vmem>>, vector<8x32xf32>
      %c0_14 = arith.constant 0 : index
      %c0_15 = arith.constant 0 : index
      %20 = vector.load %arg4[%c0_14, %c0_15] : memref<32x128xf32, #tpu.memory_space<vmem>>, vector<32x128xf32>
      %cst_16 = arith.constant dense<0.000000e+00> : vector<8x128xf32>
      %21 = tpu.matmul %19, %20, %cst_16 {dimension_numbers = #tpu.dot_dimension_numbers<[1], [0], [0], [1], [0, 0, 1, 1], [], []>} : vector<8x32xf32>, vector<32x128xf32>, vector<8x128xf32> -> vector<8x128xf32>
      %c0_17 = arith.constant 0 : index
      %c0_18 = arith.constant 0 : index
      %22 = vector.load %arg5[%c0_17, %c0_18] : memref<1x128xf32, #tpu.memory_space<vmem>>, vector<1x128xf32>
      %23 = vector.broadcast %22 : vector<1x128xf32> to vector<8x128xf32>
      %24 = arith.addf %21, %23 : vector<8x128xf32>
      %cst_19 = arith.constant dense<0xFF800000> : vector<8xf32>
      %25 = vector.multi_reduction <maximumf>, %24, %cst_19 [1] : vector<8x128xf32> to vector<8xf32>
      %26 = vector.shape_cast %25 : vector<8xf32> to vector<8x1xf32>
      %27 = vector.broadcast %26 : vector<8x1xf32> to vector<8x128xf32>
      %28 = arith.subf %24, %27 : vector<8x128xf32>
      %29 = math.exp %28 : vector<8x128xf32>
      %cst_20 = arith.constant dense<0.000000e+00> : vector<8xf32>
      %30 = vector.multi_reduction <add>, %29, %cst_20 [1] : vector<8x128xf32> to vector<8xf32>
      %31 = vector.shape_cast %30 : vector<8xf32> to vector<8x1xf32>
      %32 = tpu.reciprocal %31 : vector<8x1xf32> -> vector<8x1xf32>
      %33 = vector.broadcast %32 : vector<8x1xf32> to vector<8x128xf32>
      %34 = arith.mulf %29, %33 : vector<8x128xf32>
      %c0_21 = arith.constant 0 : index
      %c0_22 = arith.constant 0 : index
      %35 = vector.load %arg6[%c0_21, %c0_22] : memref<8x128xf32, #tpu.memory_space<vmem>>, vector<8x128xf32>
      tpu.vector_store %arg6[%c0_21, %c0_22], %34 {strides = array<i32>} : memref<8x128xf32, #tpu.memory_space<vmem>>, vector<8x128xf32>,
    } else {
    }
    return
  }
  func.func @transform_0(%arg0: i32, %arg1: i32) -> (i32, i32, i32) {
    %c0_i32 = arith.constant 0 : i32
    %c0_i32_0 = arith.constant 0 : i32
    return %arg0, %arg1, %c0_i32 : i32, i32, i32
  }
  func.func @transform_1(%arg0: i32, %arg1: i32) -> (i32, i32) {
    %c0_i32 = arith.constant 0 : i32
    %c0_i32_0 = arith.constant 0 : i32
    %c0_i32_1 = arith.constant 0 : i32
    return %c0_i32, %c0_i32_0 : i32, i32
  }
  func.func @transform_2(%arg0: i32, %arg1: i32) -> (i32, i32) {
    %c0_i32 = arith.constant 0 : i32
    %c0_i32_0 = arith.constant 0 : i32
    %c0_i32_1 = arith.constant 0 : i32
    return %c0_i32, %c0_i32_0 : i32, i32
  }
  func.func @transform_3(%arg0: i32, %arg1: i32) -> (i32, i32) {
    %c0_i32 = arith.constant 0 : i32
    %c0_i32_0 = arith.constant 0 : i32
    %c0_i32_1 = arith.constant 0 : i32
    return %c0_i32, %c0_i32_0 : i32, i32
  }
  func.func @transform_4(%arg0: i32, %arg1: i32) -> (i32, i32) {
    %c0_i32 = arith.constant 0 : i32
    %c0_i32_0 = arith.constant 0 : i32
    return %arg0, %c0_i32 : i32, i32
  }
}

</mosaic_0001>

<bundles_post_ra>
// kernel: tpu_custom_call.1
= control target key start
LH: loop header
LB: loop body
LE: loop exit
PB: predicated region body
PF: predicated region fallthrough
CT: control target
= control target key end

     0   :  { %9 = vsyncpa [#allocation4], 0  ;;  %s462_s0 = inlined_call_operand.hbm [shape: f32[8,8,32], index: 0, kind: input, shape index: {}]   ;;  %s463_s1 = inlined_call_operand.hbm [shape: f32[1,32], index: 1, kind: input, shape index: {}]   ;;  %s464_s2 = inlined_call_operand.hbm [shape: f32[32,128], index: 2, kind: input, shape index: {}]   ;;  %s465_s3 = inlined_call_operand.vmem [shape: f32[1,128], index: 3, kind: input, shape index: {}]   ;;  %s466_s4 = inlined_call_operand.hbm [shape: f32[8,128], index: 4, kind: output, shape index: {}]  }
   0x1   :  { %10 = vsyncpa [#allocation7], 0  ;;  %s30_s17 = sshll.u32 %s463_s1, 4  ;;  %s31_s17 = int_to_ptr.hbm [resolvable:$true] %s30_s17 }
   0x2   :  { %11 = vsyncpa [#allocation5], 0  ;;  %s396_s18 = smov [#allocation6]   ;;  %s16_s22 = sshll.u32 %s462_s0, 4  ;;  %s17_s22 = int_to_ptr.hbm [resolvable:$true] %s16_s22 }
   0x3   :  { %s32_s19 = sshll.u32 %s396_s18, 4  ;;  %s397_s23 = smov [#allocation3]   ;;  %s33_s19 = int_to_ptr.vmem [resolvable:$true] %s32_s19 }
   0x4   :  { %35 = dma.hbm_to_vmem [thread:$0]  %s31_s17, 16, %s33_s19, [#allocation7]  }
   0x5   :  { %s18_s24 = sshll.u32 %s397_s23, 4  ;;  %s398_s25 = smov 128   ;;  %s19_s24 = int_to_ptr.vmem [resolvable:$true] %s18_s24 }
   0x6   :  { %s399_s26 = smov 8   ;;  %s40_s1 = sshll.u32 %s464_s2, 4  ;;  %s41_s1 = int_to_ptr.hbm [resolvable:$true] %s40_s1 }
   0x7   :  { %24 = dma.hbm_to_vmem [thread:$0]  %s17_s22, 1024, %s19_s24, [#allocation4], %s398_s25, %s398_s25, %s399_s26  }
   0x8   :  { %s400_s29 = smov [#allocation8]  }
   0x9   :  { %s42_s30 = sshll.u32 %s400_s29, 4  ;;  %s43_s30 = int_to_ptr.vmem [resolvable:$true] %s42_s30 }
   0xa   :  { %48 = dma.hbm_to_vmem [thread:$0]  %s41_s1, 512, %s43_s30, [#allocation7], %s398_s25, %s398_s25, %s399_s26  }
   0xb   :  { %390 = dma.done.wait [#allocation4], 1024  }
   0xc   :  { %391 = vsyncadd [#allocation4], 4294966272 }
   0xd   :  { %392 = dma.done.wait [#allocation7], 528  }
   0xe   :  { %393 = vsyncadd [#allocation7], 4294966768  ;;  %v71_v0 = vld [vmem:[#allocation3 + $0x10] sm:$0xff]  ;;  %v288_v1 = vld [vmem:[#allocation6] ss:$0 sm:$0xff]  ;;  %vm67_vm0 = vcmask 261120  }
   0xf   :  { %v69_v2 = vld [vmem:[#allocation3] sm:$0xff]  ;;  %v83_v4 = vmul.f32 %v288_v1, %v71_v0  ;;  %v72_v7 = vld [vmem:[#allocation3 + $0x18] sm:$0xff]  ;;  %v70_v8 = vld [vmem:[#allocation3 + $0x8] sm:$0xff]  ;;  %v401_v25 = vmov 0.0   ;;  %vm187_vm1 = vcmask 1041409   ;;  %vm189_vm2 = vcmask 1042434  }
  0x10   :  { %v73_v3 = vld [vmem:[#allocation3 + $0x20] sm:$0xff]  ;;  %v81_v5 = vmul.f32 %v288_v1, %v69_v2  ;;  %v74_v12 = vld [vmem:[#allocation3 + $0x28] sm:$0xff]  ;;  %v84_v13 = vmul.f32 %v288_v1, %v72_v7  ;;  %v82_v14 = vmul.f32 %v288_v1, %v70_v8  ;;  %v76_v19 = vld [vmem:[#allocation3 + $0x38] sm:$0xff]  ;;  %68 = vst.msk [vmem:[#allocation2] sm:$0xff] %vm67_vm0, %v401_v25  ;;  %vm191_vm3 = vcmask 1043459   ;;  %s269_s8 = sshll.u32 %s466_s4, 4  ;;  %s270_s8 = int_to_ptr.hbm [resolvable:$true] %s269_s8 }
  0x11   :  { %v85_v6 = vmul.f32 %v288_v1, %v73_v3  ;;  %v96_v9 = vsel %vm67_vm0, %v83_v4, 0.0  ;;  %v86_v15 = vmul.f32 %v288_v1, %v74_v12  ;;  %v75_v20 = vld [vmem:[#allocation3 + $0x30] sm:$0xff]  ;;  %v88_v21 = vmul.f32 %v288_v1, %v76_v19  ;;  %v211_v37 = vld [vmem:[#allocation8 + $0x18] sm:$0xff]  ;;  %v208_v45 = vld [vmem:[#allocation8] sm:$0xff] }
  0x12   :  { %v90_v10 = vsel %vm67_vm0, %v81_v5, 0.0  ;;  %97 = vadd.xlane.f32.xlu1 %v96_v9  ;;  %v99_v16 = vsel %vm67_vm0, %v84_v13, 0.0  ;;  %v93_v17 = vsel %vm67_vm0, %v82_v14, 0.0  ;;  %v87_v22 = vmul.f32 %v288_v1, %v75_v20  ;;  %v210_v38 = vld [vmem:[#allocation8 + $0x10] sm:$0xff]  ;;  %231 = vmatpush.msra.mxu0 %v211_v37  ;;  %v209_v41 = vld [vmem:[#allocation8 + $0x8] sm:$0xff] }
  0x13   :  { %v102_v11 = vsel %vm67_vm0, %v85_v6, 0.0  ;;  %91 = vadd.xlane.f32.xlu0 %v90_v10  ;;  %v105_v18 = vsel %vm67_vm0, %v86_v15, 0.0  ;;  %v111_v23 = vsel %vm67_vm0, %v88_v21, 0.0  ;;  %vm193_vm4 = vcmask 1044484  }
  0x14   :  { %103 = vadd.xlane.f32.xlu2 %v102_v11  ;;  %v108_v24 = vsel %vm67_vm0, %v87_v22, 0.0  ;;  %232 = vmatpush.msra.mxu0 %v210_v38  ;;  %vm195_vm5 = vcmask 1045509   ;;  %vm197_vm6 = vcmask 1046534   ;;  %vm199_vm7 = vcmask 1047559  }
  0x16   :  { %233 = vmatpush.msra.mxu0 %v209_v41 }
  0x18   :  { %234 = vmatpush.msra.mxu0 %v208_v45 }
  0x1a   :  { %100 = vadd.xlane.f32.xlu1 %v99_v16 }
  0x1b   :  { %94 = vadd.xlane.f32.xlu0 %v93_v17 }
  0x1c   :  { %106 = vadd.xlane.f32.xlu2 %v105_v18 }
  0x22   :  { %112 = vadd.xlane.f32.xlu1 %v111_v23 }
  0x23   :  { %109 = vadd.xlane.f32.xlu0 %v108_v24 }
  0x85   :  { %v98_v26 = vpop.xlane.xlu1 %97 }
  0x86   :  { %v92_v27 = vpop.xlane.xlu0 %91  ;;  %v117_v28 = vmul.f32 %v98_v26, %v71_v0 }
  0x87   :  { %v115_v29 = vmul.f32 %v92_v27, %v69_v2  ;;  %v104_v30 = vpop.xlane.xlu2 %103 }
  0x88   :  { %v119_v31 = vmul.f32 %v104_v30, %v73_v3  ;;  %v137_v32 = vsel %vm67_vm0, %v117_v28, 0.0 }
  0x89   :  { %v123_v33 = vsel %vm67_vm0, %v115_v29, 0.0  ;;  %v138_v34 = vrot.slane %v137_v32, 4 }
  0x8a   :  { %v124_v35 = vrot.slane %v123_v33, 4  ;;  %v151_v36 = vsel %vm67_vm0, %v119_v31, 0.0 }
  0x8b   :  { %v152_v39 = vrot.slane %v151_v36, 4  ;;  %v139_v42 = vadd.f32 %v138_v34, %v137_v32 }
  0x8c   :  { %v125_v40 = vadd.f32 %v124_v35, %v123_v33 }
  0x8d   :  { %v101_v43 = vpop.xlane.xlu1 %100  ;;  %v153_v46 = vadd.f32 %v152_v39, %v151_v36  ;;  %v140_v52 = vrot.slane %v139_v42, 2 }
  0x8e   :  { %v95_v44 = vpop.xlane.xlu0 %94  ;;  %v118_v47 = vmul.f32 %v101_v43, %v72_v7  ;;  %v126_v50 = vrot.slane %v125_v40, 2  ;;  %v114_v43 = vld [vmem:[#allocation2] sm:$0xff] }
  0x8f   :  { %v116_v48 = vmul.f32 %v95_v44, %v70_v8  ;;  %v107_v49 = vpop.xlane.xlu2 %106  ;;  %v154_v57 = vrot.slane %v153_v46, 2  ;;  %v141_v62 = vadd.f32 %v140_v52, %v139_v42 }
  0x90   :  { %v120_v51 = vmul.f32 %v107_v49, %v74_v12  ;;  %v144_v53 = vsel %vm67_vm0, %v118_v47, 0.0  ;;  %v127_v59 = vadd.f32 %v126_v50, %v125_v40 }
  0x91   :  { %v130_v54 = vsel %vm67_vm0, %v116_v48, 0.0  ;;  %v145_v55 = vrot.slane %v144_v53, 4  ;;  %v155_v4 = vadd.f32 %v154_v57, %v153_v46  ;;  %v142_v11 = vrot.slane %v141_v62, 1  ;;  %v289_v48 = vld [vmem:[%s465_s3] ss:$0 sm:$0xff]  ;;  %s402_s3 = smov [#allocation9]  }
  0x92   :  { %v131_v56 = vrot.slane %v130_v54, 4  ;;  %v158_v58 = vsel %vm67_vm0, %v120_v51, 0.0  ;;  %v128_v8 = vrot.slane %v127_v59, 1  ;;  %s267_s5 = sshll.u32 %s402_s3, 4  ;;  %s268_s5 = int_to_ptr.vmem [resolvable:$true] %s267_s5 }
  0x93   :  { %v146_v60 = vadd.f32 %v145_v55, %v144_v53  ;;  %v159_v63 = vrot.slane %v158_v58, 4  ;;  %v156_v21 = vrot.slane %v155_v4, 1  ;;  %v143_v25 = vadd.f32 %v142_v11, %v141_v62 }
  0x94   :  { %v132_v61 = vadd.f32 %v131_v56, %v130_v54  ;;  %v129_v23 = vadd.f32 %v128_v8, %v127_v59 }
  0x95   :  { %v147_v0 = vrot.slane %v146_v60, 2  ;;  %v113_v2 = vpop.xlane.xlu1 %112  ;;  %v160_v5 = vadd.f32 %v159_v63, %v158_v58  ;;  %v157_v32 = vadd.f32 %v156_v21, %v155_v4 }
  0x96   :  { %v133_v1 = vrot.slane %v132_v61, 2  ;;  %v110_v3 = vpop.xlane.xlu0 %109  ;;  %v122_v6 = vmul.f32 %v113_v2, %v76_v19 }
  0x97   :  { %v121_v7 = vmul.f32 %v110_v3, %v75_v20  ;;  %v148_v9 = vadd.f32 %v147_v0, %v146_v60  ;;  %v161_v12 = vrot.slane %v160_v5, 2 }
  0x98   :  { %v134_v10 = vadd.f32 %v133_v1, %v132_v61  ;;  %v172_v13 = vsel %vm67_vm0, %v122_v6, 0.0 }
  0x99   :  { %v165_v14 = vsel %vm67_vm0, %v121_v7, 0.0  ;;  %v149_v15 = vrot.slane %v148_v9, 1  ;;  %v173_v17 = vrot.slane %v172_v13, 4  ;;  %v162_v22 = vadd.f32 %v161_v12, %v160_v5 }
  0x9a   :  { %v135_v16 = vrot.slane %v134_v10, 1  ;;  %v166_v18 = vrot.slane %v165_v14, 4 }
  0x9b   :  { %v174_v20 = vadd.f32 %v173_v17, %v172_v13  ;;  %v150_v26 = vadd.f32 %v149_v15, %v148_v9  ;;  %v163_v31 = vrot.slane %v162_v22, 1 }
  0x9c   :  { %v136_v19 = vadd.f32 %v135_v16, %v134_v10  ;;  %v167_v24 = vadd.f32 %v166_v18, %v165_v14 }
  0x9d   :  { %v175_v28 = vrot.slane %v174_v20, 2  ;;  %v164_v39 = vadd.f32 %v163_v31, %v162_v22 }
  0x9e   :  { %v188_v27 = vsel %vm187_vm1, %v136_v19, %v129_v23  ;;  %v168_v29 = vrot.slane %v167_v24, 2 }
  0x9f   :  { %v190_v30 = vsel %vm189_vm2, %v143_v25, %v188_v27  ;;  %v176_v34 = vadd.f32 %v175_v28, %v174_v20 }
  0xa0   :  { %v192_v33 = vsel %vm191_vm3, %v150_v26, %v190_v30  ;;  %v169_v35 = vadd.f32 %v168_v29, %v167_v24 }
  0xa1   :  { %v194_v36 = vsel %vm193_vm4, %v157_v32, %v192_v33  ;;  %v177_v37 = vrot.slane %v176_v34, 1 }
  0xa2   :  { %v170_v38 = vrot.slane %v169_v35, 1  ;;  %v196_v42 = vsel %vm195_vm5, %v164_v39, %v194_v36 }
  0xa3   :  { %v178_v40 = vadd.f32 %v177_v37, %v176_v34 }
  0xa4   :  { %v171_v41 = vadd.f32 %v170_v38, %v169_v35 }
  0xa6   :  { %v198_v44 = vsel %vm197_vm6, %v171_v41, %v196_v42 }
  0xa7   :  { %v200_v45 = vsel %vm199_vm7, %v178_v40, %v198_v44 }
  0xa8   :  { %v202_v46 = vadd.f32 %v200_v45, %v114_v43 }
  0xaa   :  { %203 = vst.msk [vmem:[#allocation2] sm:$0xff] %vm67_vm0, %v202_v46 }
  0xb1   :  { %v207_v47 = vld [vmem:[#allocation2] sm:$0xff] }
  0xb2   :  { %280 = vmatmul.msk.f32.vlgmr.msra.gmra.mxu0 %vm67_vm0, %v207_v47 }
 0x12f   :  { %v236_v49 = vpop.f32.mrf.mxu0 }
 0x130   :  { %v237_v50 = vadd.f32 %v289_v48, %v236_v49 }
 0x132   :  { %239 = vmax.xlane.f32.xlu2 %v237_v50 }
 0x1a5   :  { %v240_v51 = vpop.xlane.xlu2 %239 }
 0x1a6   :  { %v241_v52 = vsub.f32 %v237_v50, %v240_v51 }
 0x1a8   :  { %v242_v53 = vmul.f32 1.442695, %v241_v52 }
 0x1aa   :  { %290 = vpow2.f32 %v242_v53 }
 0x1b0   :  { %v291_v54 = vpop.eup %290 }
 0x1b1   :  { %244 = vadd.xlane.f32.xlu0 %v291_v54 }
 0x224   :  { %v245_v55 = vpop.xlane.xlu0 %244 }
 0x225   :  { %292 = vrcp.f32 %v245_v55  ;;  %v257_v59 = vand.u32 2147483648, %v245_v55  ;;  %v255_v61 = vand.u32 2147483647, %v245_v55  ;;  %vm251_vm9 = vweird.f32 %v245_v55 }
 0x227   :  { %v258_v63 = vor.u32 1.1754944e-38, %v257_v59  ;;  %vm256_vm11 = vcmp.eq.f32.partialorder %v255_v61, 8.507059e+37 }
 0x22b   :  { %v293_v56 = vpop.eup %292 }
 0x22c   :  { %v247_v57 = vmul.f32 %v293_v56, %v245_v55  ;;  %vm252_vm8 = vweird.f32 %v293_v56 }
 0x22d   :  { %vm253_vm10 = vmor %vm251_vm9, %vm252_vm8 }
 0x22e   :  { %v248_v58 = vsub.f32 1.0, %v247_v57 }
 0x230   :  { %v249_v60 = vmul.f32 %v293_v56, %v248_v58 }
 0x232   :  { %v250_v62 = vadd.f32 %v293_v56, %v249_v60 }
 0x234   :  { %v254_v0 = vsel %vm253_vm10, %v293_v56, %v250_v62 }
 0x235   :  { %v259_v1 = vsel %vm256_vm11, %v258_v63, %v254_v0 }
 0x236   :  { %v260_v2 = vmul.f32 %v291_v54, %v259_v1 }
 0x238   :  { %261 = vst [vmem:[#allocation9] sm:$0xff] %v260_v2 }
 0x239   :  { %272 = dma.vmem_to_hbm [thread:$0]  %s268_s5, 128, %s270_s8, [#allocation5]  }
 0x23a   :  { %394 = dma.done.wait [#allocation5], 128  }
 0x23b   :  { %395 = vsyncadd [#allocation5], 4294967168 }
 0x23c   :  { %277 = vsyncpa [#allocation4], 1 }
 0x23d   :  { %278 = vsyncpa [#allocation7], 1 }
 0x23e   :  { %279 = vsyncpa [#allocation5], 1 }

// kernel: tpu_custom_call.1
= control target key start
LH: loop header
LB: loop body
LE: loop exit
PB: predicated region body
PF: predicated region fallthrough
CT: control target
= control target key end

     0   :  { %9 = vsyncpa [#allocation4], 0  ;;  %s462_s0 = inlined_call_operand.hbm [shape: f32[8,8,32], index: 0, kind: input, shape index: {}]   ;;  %s463_s1 = inlined_call_operand.hbm [shape: f32[1,32], index: 1, kind: input, shape index: {}]   ;;  %s464_s2 = inlined_call_operand.hbm [shape: f32[32,128], index: 2, kind: input, shape index: {}]   ;;  %s465_s3 = inlined_call_operand.vmem [shape: f32[1,128], index: 3, kind: input, shape index: {}]   ;;  %s466_s4 = inlined_call_operand.hbm [shape: f32[8,128], index: 4, kind: output, shape index: {}]  }
   0x1   :  { %10 = vsyncpa [#allocation7], 0  ;;  %s30_s17 = sshll.u32 %s463_s1, 4  ;;  %s31_s17 = int_to_ptr.hbm [resolvable:$true] %s30_s17 }
   0x2   :  { %11 = vsyncpa [#allocation5], 0  ;;  %s396_s18 = smov [#allocation6]   ;;  %s16_s22 = sshll.u32 %s462_s0, 4  ;;  %s17_s22 = int_to_ptr.hbm [resolvable:$true] %s16_s22 }
   0x3   :  { %s32_s19 = sshll.u32 %s396_s18, 4  ;;  %s397_s23 = smov [#allocation3]   ;;  %s33_s19 = int_to_ptr.vmem [resolvable:$true] %s32_s19 }
   0x4   :  { %35 = dma.hbm_to_vmem [thread:$0]  %s31_s17, 16, %s33_s19, [#allocation7]  }
   0x5   :  { %s18_s24 = sshll.u32 %s397_s23, 4  ;;  %s398_s25 = smov 128   ;;  %s19_s24 = int_to_ptr.vmem [resolvable:$true] %s18_s24 }
   0x6   :  { %s399_s26 = smov 8   ;;  %s40_s1 = sshll.u32 %s464_s2, 4  ;;  %s41_s1 = int_to_ptr.hbm [resolvable:$true] %s40_s1 }
   0x7   :  { %24 = dma.hbm_to_vmem [thread:$0]  %s17_s22, 1024, %s19_s24, [#allocation4], %s398_s25, %s398_s25, %s399_s26  }
   0x8   :  { %s400_s29 = smov [#allocation8]  }
   0x9   :  { %s42_s30 = sshll.u32 %s400_s29, 4  ;;  %s43_s30 = int_to_ptr.vmem [resolvable:$true] %s42_s30 }
   0xa   :  { %48 = dma.hbm_to_vmem [thread:$0]  %s41_s1, 512, %s43_s30, [#allocation7], %s398_s25, %s398_s25, %s399_s26  }
   0xb   :  { %390 = dma.done.wait [#allocation4], 1024  }
   0xc   :  { %391 = vsyncadd [#allocation4], 4294966272 }
   0xd   :  { %392 = dma.done.wait [#allocation7], 528  }
   0xe   :  { %393 = vsyncadd [#allocation7], 4294966768  ;;  %v71_v0 = vld [vmem:[#allocation3 + $0x10] sm:$0xff]  ;;  %v288_v1 = vld [vmem:[#allocation6] ss:$0 sm:$0xff]  ;;  %vm67_vm0 = vcmask 261120  }
   0xf   :  { %v69_v2 = vld [vmem:[#allocation3] sm:$0xff]  ;;  %v83_v4 = vmul.f32 %v288_v1, %v71_v0  ;;  %v72_v7 = vld [vmem:[#allocation3 + $0x18] sm:$0xff]  ;;  %v70_v8 = vld [vmem:[#allocation3 + $0x8] sm:$0xff]  ;;  %v401_v25 = vmov 0.0   ;;  %vm187_vm1 = vcmask 1041409   ;;  %vm189_vm2 = vcmask 1042434  }
  0x10   :  { %v73_v3 = vld [vmem:[#allocation3 + $0x20] sm:$0xff]  ;;  %v81_v5 = vmul.f32 %v288_v1, %v69_v2  ;;  %v74_v12 = vld [vmem:[#allocation3 + $0x28] sm:$0xff]  ;;  %v84_v13 = vmul.f32 %v288_v1, %v72_v7  ;;  %v82_v14 = vmul.f32 %v288_v1, %v70_v8  ;;  %v76_v19 = vld [vmem:[#allocation3 + $0x38] sm:$0xff]  ;;  %68 = vst.msk [vmem:[#allocation2] sm:$0xff] %vm67_vm0, %v401_v25  ;;  %vm191_vm3 = vcmask 1043459   ;;  %s269_s8 = sshll.u32 %s466_s4, 4  ;;  %s270_s8 = int_to_ptr.hbm [resolvable:$true] %s269_s8 }
  0x11   :  { %v85_v6 = vmul.f32 %v288_v1, %v73_v3  ;;  %v96_v9 = vsel %vm67_vm0, %v83_v4, 0.0  ;;  %v86_v15 = vmul.f32 %v288_v1, %v74_v12  ;;  %v75_v20 = vld [vmem:[#allocation3 + $0x30] sm:$0xff]  ;;  %v88_v21 = vmul.f32 %v288_v1, %v76_v19  ;;  %v211_v37 = vld [vmem:[#allocation8 + $0x18] sm:$0xff]  ;;  %v208_v45 = vld [vmem:[#allocation8] sm:$0xff] }
  0x12   :  { %v90_v10 = vsel %vm67_vm0, %v81_v5, 0.0  ;;  %97 = vadd.xlane.f32.xlu1 %v96_v9  ;;  %v99_v16 = vsel %vm67_vm0, %v84_v13, 0.0  ;;  %v93_v17 = vsel %vm67_vm0, %v82_v14, 0.0  ;;  %v87_v22 = vmul.f32 %v288_v1, %v75_v20  ;;  %v210_v38 = vld [vmem:[#allocation8 + $0x10] sm:$0xff]  ;;  %231 = vmatpush.msra.mxu0 %v211_v37  ;;  %v209_v41 = vld [vmem:[#allocation8 + $0x8] sm:$0xff] }
  0x13   :  { %v102_v11 = vsel %vm67_vm0, %v85_v6, 0.0  ;;  %91 = vadd.xlane.f32.xlu0 %v90_v10  ;;  %v105_v18 = vsel %vm67_vm0, %v86_v15, 0.0  ;;  %v111_v23 = vsel %vm67_vm0, %v88_v21, 0.0  ;;  %vm193_vm4 = vcmask 1044484  }
  0x14   :  { %103 = vadd.xlane.f32.xlu2 %v102_v11  ;;  %v108_v24 = vsel %vm67_vm0, %v87_v22, 0.0  ;;  %232 = vmatpush.msra.mxu0 %v210_v38  ;;  %vm195_vm5 = vcmask 1045509   ;;  %vm197_vm6 = vcmask 1046534   ;;  %vm199_vm7 = vcmask 1047559  }
  0x16   :  { %233 = vmatpush.msra.mxu0 %v209_v41 }
  0x18   :  { %234 = vmatpush.msra.mxu0 %v208_v45 }
  0x1a   :  { %100 = vadd.xlane.f32.xlu1 %v99_v16 }
  0x1b   :  { %94 = vadd.xlane.f32.xlu0 %v93_v17 }
  0x1c   :  { %106 = vadd.xlane.f32.xlu2 %v105_v18 }
  0x22   :  { %112 = vadd.xlane.f32.xlu1 %v111_v23 }
  0x23   :  { %109 = vadd.xlane.f32.xlu0 %v108_v24 }
  0x85   :  { %v98_v26 = vpop.xlane.xlu1 %97 }
  0x86   :  { %v92_v27 = vpop.xlane.xlu0 %91  ;;  %v117_v28 = vmul.f32 %v98_v26, %v71_v0 }
  0x87   :  { %v115_v29 = vmul.f32 %v92_v27, %v69_v2  ;;  %v104_v30 = vpop.xlane.xlu2 %103 }
  0x88   :  { %v119_v31 = vmul.f32 %v104_v30, %v73_v3  ;;  %v137_v32 = vsel %vm67_vm0, %v117_v28, 0.0 }
  0x89   :  { %v123_v33 = vsel %vm67_vm0, %v115_v29, 0.0  ;;  %v138_v34 = vrot.slane %v137_v32, 4 }
  0x8a   :  { %v124_v35 = vrot.slane %v123_v33, 4  ;;  %v151_v36 = vsel %vm67_vm0, %v119_v31, 0.0 }
  0x8b   :  { %v152_v39 = vrot.slane %v151_v36, 4  ;;  %v139_v42 = vadd.f32 %v138_v34, %v137_v32 }
  0x8c   :  { %v125_v40 = vadd.f32 %v124_v35, %v123_v33 }
  0x8d   :  { %v101_v43 = vpop.xlane.xlu1 %100  ;;  %v153_v46 = vadd.f32 %v152_v39, %v151_v36  ;;  %v140_v52 = vrot.slane %v139_v42, 2 }
  0x8e   :  { %v95_v44 = vpop.xlane.xlu0 %94  ;;  %v118_v47 = vmul.f32 %v101_v43, %v72_v7  ;;  %v126_v50 = vrot.slane %v125_v40, 2  ;;  %v114_v43 = vld [vmem:[#allocation2] sm:$0xff] }
  0x8f   :  { %v116_v48 = vmul.f32 %v95_v44, %v70_v8  ;;  %v107_v49 = vpop.xlane.xlu2 %106  ;;  %v154_v57 = vrot.slane %v153_v46, 2  ;;  %v141_v62 = vadd.f32 %v140_v52, %v139_v42 }
  0x90   :  { %v120_v51 = vmul.f32 %v107_v49, %v74_v12  ;;  %v144_v53 = vsel %vm67_vm0, %v118_v47, 0.0  ;;  %v127_v59 = vadd.f32 %v126_v50, %v125_v40 }
  0x91   :  { %v130_v54 = vsel %vm67_vm0, %v116_v48, 0.0  ;;  %v145_v55 = vrot.slane %v144_v53, 4  ;;  %v155_v4 = vadd.f32 %v154_v57, %v153_v46  ;;  %v142_v11 = vrot.slane %v141_v62, 1  ;;  %v289_v48 = vld [vmem:[%s465_s3] ss:$0 sm:$0xff]  ;;  %s402_s3 = smov [#allocation9]  }
  0x92   :  { %v131_v56 = vrot.slane %v130_v54, 4  ;;  %v158_v58 = vsel %vm67_vm0, %v120_v51, 0.0  ;;  %v128_v8 = vrot.slane %v127_v59, 1  ;;  %s267_s5 = sshll.u32 %s402_s3, 4  ;;  %s268_s5 = int_to_ptr.vmem [resolvable:$true] %s267_s5 }
  0x93   :  { %v146_v60 = vadd.f32 %v145_v55, %v144_v53  ;;  %v159_v63 = vrot.slane %v158_v58, 4  ;;  %v156_v21 = vrot.slane %v155_v4, 1  ;;  %v143_v25 = vadd.f32 %v142_v11, %v141_v62 }
  0x94   :  { %v132_v61 = vadd.f32 %v131_v56, %v130_v54  ;;  %v129_v23 = vadd.f32 %v128_v8, %v127_v59 }
  0x95   :  { %v147_v0 = vrot.slane %v146_v60, 2  ;;  %v113_v2 = vpop.xlane.xlu1 %112  ;;  %v160_v5 = vadd.f32 %v159_v63, %v158_v58  ;;  %v157_v32 = vadd.f32 %v156_v21, %v155_v4 }
  0x96   :  { %v133_v1 = vrot.slane %v132_v61, 2  ;;  %v110_v3 = vpop.xlane.xlu0 %109  ;;  %v122_v6 = vmul.f32 %v113_v2, %v76_v19 }
  0x97   :  { %v121_v7 = vmul.f32 %v110_v3, %v75_v20  ;;  %v148_v9 = vadd.f32 %v147_v0, %v146_v60  ;;  %v161_v12 = vrot.slane %v160_v5, 2 }
  0x98   :  { %v134_v10 = vadd.f32 %v133_v1, %v132_v61  ;;  %v172_v13 = vsel %vm67_vm0, %v122_v6, 0.0 }
  0x99   :  { %v165_v14 = vsel %vm67_vm0, %v121_v7, 0.0  ;;  %v149_v15 = vrot.slane %v148_v9, 1  ;;  %v173_v17 = vrot.slane %v172_v13, 4  ;;  %v162_v22 = vadd.f32 %v161_v12, %v160_v5 }
  0x9a   :  { %v135_v16 = vrot.slane %v134_v10, 1  ;;  %v166_v18 = vrot.slane %v165_v14, 4 }
  0x9b   :  { %v174_v20 = vadd.f32 %v173_v17, %v172_v13  ;;  %v150_v26 = vadd.f32 %v149_v15, %v148_v9  ;;  %v163_v31 = vrot.slane %v162_v22, 1 }
  0x9c   :  { %v136_v19 = vadd.f32 %v135_v16, %v134_v10  ;;  %v167_v24 = vadd.f32 %v166_v18, %v165_v14 }
  0x9d   :  { %v175_v28 = vrot.slane %v174_v20, 2  ;;  %v164_v39 = vadd.f32 %v163_v31, %v162_v22 }
  0x9e   :  { %v188_v27 = vsel %vm187_vm1, %v136_v19, %v129_v23  ;;  %v168_v29 = vrot.slane %v167_v24, 2 }
  0x9f   :  { %v190_v30 = vsel %vm189_vm2, %v143_v25, %v188_v27  ;;  %v176_v34 = vadd.f32 %v175_v28, %v174_v20 }
  0xa0   :  { %v192_v33 = vsel %vm191_vm3, %v150_v26, %v190_v30  ;;  %v169_v35 = vadd.f32 %v168_v29, %v167_v24 }
  0xa1   :  { %v194_v36 = vsel %vm193_vm4, %v157_v32, %v192_v33  ;;  %v177_v37 = vrot.slane %v176_v34, 1 }
  0xa2   :  { %v170_v38 = vrot.slane %v169_v35, 1  ;;  %v196_v42 = vsel %vm195_vm5, %v164_v39, %v194_v36 }
  0xa3   :  { %v178_v40 = vadd.f32 %v177_v37, %v176_v34 }
  0xa4   :  { %v171_v41 = vadd.f32 %v170_v38, %v169_v35 }
  0xa6   :  { %v198_v44 = vsel %vm197_vm6, %v171_v41, %v196_v42 }
  0xa7   :  { %v200_v45 = vsel %vm199_vm7, %v178_v40, %v198_v44 }
  0xa8   :  { %v202_v46 = vadd.f32 %v200_v45, %v114_v43 }
  0xaa   :  { %203 = vst.msk [vmem:[#allocation2] sm:$0xff] %vm67_vm0, %v202_v46 }
  0xb1   :  { %v207_v47 = vld [vmem:[#allocation2] sm:$0xff] }
  0xb2   :  { %280 = vmatmul.msk.f32.vlgmr.msra.gmra.mxu0 %vm67_vm0, %v207_v47 }
 0x12f   :  { %v236_v49 = vpop.f32.mrf.mxu0 }
 0x130   :  { %v237_v50 = vadd.f32 %v289_v48, %v236_v49 }
 0x132   :  { %239 = vmax.xlane.f32.xlu2 %v237_v50 }
 0x1a5   :  { %v240_v51 = vpop.xlane.xlu2 %239 }
 0x1a6   :  { %v241_v52 = vsub.f32 %v237_v50, %v240_v51 }
 0x1a8   :  { %v242_v53 = vmul.f32 1.442695, %v241_v52 }
 0x1aa   :  { %290 = vpow2.f32 %v242_v53 }
 0x1b0   :  { %v291_v54 = vpop.eup %290 }
 0x1b1   :  { %244 = vadd.xlane.f32.xlu0 %v291_v54 }
 0x224   :  { %v245_v55 = vpop.xlane.xlu0 %244 }
 0x225   :  { %292 = vrcp.f32 %v245_v55  ;;  %v257_v59 = vand.u32 2147483648, %v245_v55  ;;  %v255_v61 = vand.u32 2147483647, %v245_v55  ;;  %vm251_vm9 = vweird.f32 %v245_v55 }
 0x227   :  { %v258_v63 = vor.u32 1.1754944e-38, %v257_v59  ;;  %vm256_vm11 = vcmp.eq.f32.partialorder %v255_v61, 8.507059e+37 }
 0x22b   :  { %v293_v56 = vpop.eup %292 }
 0x22c   :  { %v247_v57 = vmul.f32 %v293_v56, %v245_v55  ;;  %vm252_vm8 = vweird.f32 %v293_v56 }
 0x22d   :  { %vm253_vm10 = vmor %vm251_vm9, %vm252_vm8 }
 0x22e   :  { %v248_v58 = vsub.f32 1.0, %v247_v57 }
 0x230   :  { %v249_v60 = vmul.f32 %v293_v56, %v248_v58 }
 0x232   :  { %v250_v62 = vadd.f32 %v293_v56, %v249_v60 }
 0x234   :  { %v254_v0 = vsel %vm253_vm10, %v293_v56, %v250_v62 }
 0x235   :  { %v259_v1 = vsel %vm256_vm11, %v258_v63, %v254_v0 }
 0x236   :  { %v260_v2 = vmul.f32 %v291_v54, %v259_v1 }
 0x238   :  { %261 = vst [vmem:[#allocation9] sm:$0xff] %v260_v2 }
 0x239   :  { %272 = dma.vmem_to_hbm [thread:$0]  %s268_s5, 128, %s270_s8, [#allocation5]  }
 0x23a   :  { %394 = dma.done.wait [#allocation5], 128  }
 0x23b   :  { %395 = vsyncadd [#allocation5], 4294967168 }
 0x23c   :  { %277 = vsyncpa [#allocation4], 1 }
 0x23d   :  { %278 = vsyncpa [#allocation7], 1 }
 0x23e   :  { %279 = vsyncpa [#allocation5], 1 }

</bundles_post_ra>
